<compile_context>
chip_gen: v5e
topology: v5e:2x2
jax: 0.10.0
libtpu: 0.0.40
codegen_flags: <defaults>
</compile_context>

<pallas_src>
import functools

import jax
import jax.numpy as jnp
import numpy as np
from jax import lax
from jax.experimental import pallas as pl
from jax.experimental.pallas import tpu as pltpu

_LANES = 128          # vreg lane width: VPU-friendly accumulation slabs
_SCALE_CHUNK = 512    # lane chunk for the elementwise x * gate stream
_MAX_TILE_HW = 2048   # cap on the HW tile width for the two-pass fallback


def _tpu_vmem_capacity():
    """Physical VMEM bytes (64 MiB on v7x, 128 MiB on v5e/v6e)."""
    try:
        return int(pltpu.get_tpu_info().vmem_capacity_bytes)
    except Exception:  # be conservative if the query is unavailable
        return 64 << 20


def _vmem_limit(need_bytes, cap_bytes):
    """Scoped-VMEM limit: enough for our buffers + headroom, below physical."""
    return int(min(cap_bytes - (2 << 20), max(need_bytes + (4 << 20), 32 << 20)))


# --------------------------------------------------------------------------
# Fused single-pass kernel: pool + MLP + sigmoid + scale, one batch per step.
# --------------------------------------------------------------------------
def _fused_kernel(x_ref, w1_ref, b1_ref, w2_ref, b2_ref, o_ref,
                  sum_sc, max_sc, *, inv_hw):
    """x_ref/o_ref: (1, C, HW) resident in VMEM; w*: shared MLP params.

    Pools (avg & max over HW) with pure VPU add/max into (C, 128) scratch,
    reduces across lanes once, runs the tiny shared MLP + sigmoid, then
    applies the per-channel gate to the same VMEM copy of x.
    """
    C, HW = x_ref.shape[1], x_ref.shape[2]
    n_slabs = HW // _LANES
    rem = HW - n_slabs * _LANES

    # ---- pooling: 128-lane slabs, VPU-only accumulation -------------------
    sum_sc[...] = jnp.zeros_like(sum_sc)
    max_sc[...] = jnp.full_like(max_sc, -jnp.inf)

    def pool_body(k, carry):
        off = pl.multiple_of(k * _LANES, _LANES)
        slab = x_ref[0, :, pl.ds(off, _LANES)]                 # (C, 128)
        sum_sc[...] += slab
        max_sc[...] = jnp.maximum(max_sc[...], slab)
        return carry

    if n_slabs > 0:
        lax.fori_loop(0, n_slabs, pool_body, 0, unroll=n_slabs <= 8)

    s = jnp.sum(sum_sc[...], axis=1, keepdims=True)            # (C, 1)
    m = jnp.max(max_sc[...], axis=1, keepdims=True)            # (C, 1)
    if rem:                                                    # ragged tail (HW % 128)
        tail = x_ref[0, :, pl.ds(n_slabs * _LANES, rem)]
        s = s + jnp.sum(tail, axis=1, keepdims=True)
        m = jnp.maximum(m, jnp.max(tail, axis=1, keepdims=True))

    # ---- tiny shared MLP: avg/max stacked as a (C, 2) rhs -> one matmul
    #      per layer instead of two serialized N=1 matvecs -------------------
    p = jnp.concatenate([s * inv_hw, m], axis=1)               # (C, 2)
    h = jnp.maximum(
        jnp.dot(w1_ref[...], p, preferred_element_type=jnp.float32)
        + b1_ref[...], 0.0)                                    # (Cmid, 2)
    att = (jnp.dot(w2_ref[...], h, preferred_element_type=jnp.float32)
           + b2_ref[...])                                      # (C, 2)
    gate = jax.nn.sigmoid(att[:, 0:1] + att[:, 1:2])           # (C, 1)

    # ---- scale: stream x * gate in bounded lane chunks --------------------
    chunk = min(_SCALE_CHUNK, HW)
    n_c = HW // chunk
    rem_c = HW - n_c * chunk

    def scale_body(k, carry):
        off = pl.multiple_of(k * chunk, chunk)
        o_ref[0, :, pl.ds(off, chunk)] = x_ref[0, :, pl.ds(off, chunk)] * gate
        return carry

    if n_c > 0:
        lax.fori_loop(0, n_c, scale_body, 0, unroll=n_c <= 8)
    if rem_c:
        o_ref[0, :, pl.ds(n_c * chunk, rem_c)] = (
            x_ref[0, :, pl.ds(n_c * chunk, rem_c)] * gate)


# --------------------------------------------------------------------------
# Two-pass fallback: stage 1 (pooling), XLA MLP, stage 2 (scaling).
# --------------------------------------------------------------------------
def _pool_kernel(x_ref, pooled_ref, sum_sc, max_sc, *,
                 inv_hw, hw, tile_hw, hw_pad):
    """Grid = (B, HWp // TILE_HW).

    Accumulates per-channel sum/max over lane-dense HW tiles using (C, 128)
    VPU accumulators; on the last tile a single XLU cross-lane reduce emits
    the (C, 2) [avg, max] descriptors.  The MLP + sigmoid run outside the
    kernel as one batched XLA matmul per layer.
    """
    t = pl.program_id(1)

    @pl.when(t == 0)
    def _():
        sum_sc[...] = jnp.zeros_like(sum_sc)
        max_sc[...] = jnp.full_like(max_sc, -jnp.inf)

    n_slabs = tile_hw // _LANES          # tile_hw is an exact multiple of 128
    base = t * tile_hw

    def body(k, carry):
        off = pl.multiple_of(k * _LANES, _LANES)
        slab = x_ref[0, :, pl.ds(off, _LANES)]                 # (C, 128)
        sum_sc[...] += slab                # zero padding is harmless for the sum
        if hw_pad:                         # static: mask padded lanes for the max
            gidx = base + off + lax.broadcasted_iota(jnp.int32, slab.shape, 1)
            slab = jnp.where(gidx < hw, slab, -jnp.inf)
        max_sc[...] = jnp.maximum(max_sc[...], slab)
        return carry

    lax.fori_loop(0, n_slabs, body, 0, unroll=n_slabs <= 8)

    @pl.when(t == pl.num_programs(1) - 1)
    def _():
        s = jnp.sum(sum_sc[...], axis=1, keepdims=True) * inv_hw   # (C, 1)
        m = jnp.max(max_sc[...], axis=1, keepdims=True)            # (C, 1)
        pooled_ref[0] = jnp.concatenate([s, m], axis=1)            # (C, 2)


def _scale_kernel(x_ref, scale_ref, o_ref):
    """o = x * gate; the (C, 1) gate broadcasts over the lane (HW) axis."""
    o_ref[0] = x_ref[0] * scale_ref[0]


# --------------------------------------------------------------------------
# Wrapper
# --------------------------------------------------------------------------
def channel_attention(x, params):
    """x: (B, C, H, W) float32; params = (w1, b1, w2, b2)."""
    w1, b1, w2, b2 = params
    B, C, H, W = x.shape
    HW = H * W
    Cmid = w1.shape[0]
    xf = x.reshape(B, C, HW)

    vmem_cap = _tpu_vmem_capacity()
    slab_bytes = C * HW * 4
    w_bytes = 4 * (Cmid * C + Cmid + C * Cmid + C)
    scratch_bytes = 2 * C * _LANES * 4

    # -------- fused single pass: x read once + written once (2x|x| HBM) ----
    fused_need = 4 * slab_bytes + scratch_bytes + 2 * w_bytes + (1 << 20)
    if fused_need <= (vmem_cap * 3) // 4:
        out = pl.pallas_call(
            functools.partial(_fused_kernel, inv_hw=1.0 / HW),
            out_shape=jax.ShapeDtypeStruct((B, C, HW), jnp.float32),
            grid_spec=pltpu.PrefetchScalarGridSpec(
                num_scalar_prefetch=0,
                grid=(B,),
                in_specs=[
                    pl.BlockSpec((1, C, HW), lambda b: (b, 0, 0)),
                    pl.BlockSpec((Cmid, C), lambda b: (0, 0)),
                    pl.BlockSpec((Cmid, 1), lambda b: (0, 0)),
                    pl.BlockSpec((C, Cmid), lambda b: (0, 0)),
                    pl.BlockSpec((C, 1), lambda b: (0, 0)),
                ],
                out_specs=pl.BlockSpec((1, C, HW), lambda b: (b, 0, 0)),
                scratch_shapes=[pltpu.VMEM((C, _LANES), jnp.float32),
                                pltpu.VMEM((C, _LANES), jnp.float32)],
            ),
            compiler_params=pltpu.CompilerParams(
                dimension_semantics=("parallel",),
                vmem_limit_bytes=_vmem_limit(fused_need, vmem_cap)),
            cost_estimate=pl.CostEstimate(
                flops=int(3 * B * C * HW + 8 * B * C * Cmid),
                transcendentals=int(B * C),
                bytes_accessed=int(8 * B * C * HW + B * w_bytes)),
        )(xf, w1, b1, w2, b2)
        return out.reshape(B, C, H, W)

    # -------- two-pass fallback (per-batch slab too big for VMEM) ----------
    # Note: on v7x with B == 1 the pooling pass uses only one of the two
    # TensorCores; a core-split over HW with partial descriptors would fix it.
    lane_budget = ((vmem_cap // 2) // (4 * C * 4) // _LANES) * _LANES
    tile_hw = int(min(_MAX_TILE_HW, max(_LANES, lane_budget)))
    n_t = -(-HW // tile_hw)
    HWp = n_t * tile_hw
    hw_pad = HWp - HW
    if hw_pad:
        # zero pad (harmless for the sum); the max is masked in-kernel.
        xf = jnp.pad(xf, ((0, 0), (0, 0), (0, hw_pad)))

    stage1_need = 2 * C * tile_hw * 4 + scratch_bytes + 4 * C * 2 * 4 + (1 << 20)
    pooled = pl.pallas_call(
        functools.partial(_pool_kernel, inv_hw=1.0 / HW, hw=HW,
                          tile_hw=tile_hw, hw_pad=hw_pad),
        out_shape=jax.ShapeDtypeStruct((B, C, 2), jnp.float32),
        grid_spec=pltpu.PrefetchScalarGridSpec(
            num_scalar_prefetch=0,
            grid=(B, n_t),
            in_specs=[pl.BlockSpec((1, C, tile_hw), lambda b, t: (b, 0, t))],
            out_specs=pl.BlockSpec((1, C, 2), lambda b, t: (b, 0, 0)),
            scratch_shapes=[pltpu.VMEM((C, _LANES), jnp.float32),
                            pltpu.VMEM((C, _LANES), jnp.float32)],
        ),
        compiler_params=pltpu.CompilerParams(
            dimension_semantics=("parallel", "arbitrary"),
            vmem_limit_bytes=_vmem_limit(stage1_need, vmem_cap)),
        cost_estimate=pl.CostEstimate(
            flops=int(2 * B * C * HWp),
            transcendentals=0,
            bytes_accessed=int(4 * B * C * (HWp + 2))),
    )(xf)

    # Tiny shared MLP + sigmoid hoisted to plain XLA: one batched matmul per
    # layer over all B, instead of cold-path per-batch matvecs in the kernel.
    avg_p, max_p = pooled[:, :, 0], pooled[:, :, 1]            # (B, C) each

    def mlp(p):
        h = jnp.maximum(p @ w1.T + b1[:, 0], 0.0)
        return h @ w2.T + b2[:, 0]

    scale = jax.nn.sigmoid(mlp(avg_p) + mlp(max_p))[:, :, None]  # (B, C, 1)

    stage2_need = 4 * C * tile_hw * 4 + 2 * C * 4 + (1 << 20)
    out = pl.pallas_call(
        _scale_kernel,
        out_shape=jax.ShapeDtypeStruct((B, C, HWp), jnp.float32),
        grid_spec=pltpu.PrefetchScalarGridSpec(
            num_scalar_prefetch=0,
            grid=(B, n_t),
            in_specs=[pl.BlockSpec((1, C, tile_hw), lambda b, t: (b, 0, t)),
                      pl.BlockSpec((1, C, 1), lambda b, t: (b, 0, 0))],
            out_specs=pl.BlockSpec((1, C, tile_hw), lambda b, t: (b, 0, t)),
        ),
        compiler_params=pltpu.CompilerParams(
            dimension_semantics=("parallel", "parallel"),
            vmem_limit_bytes=_vmem_limit(stage2_need, vmem_cap)),
        cost_estimate=pl.CostEstimate(
            flops=int(B * C * HWp),
            transcendentals=0,
            bytes_accessed=int(8 * B * C * HWp + 4 * B * C)),
    )(xf, scale)

    if hw_pad:
        out = out[:, :, :HW]
    return out.reshape(B, C, H, W)


# --------------------------------------------------------------------------
# Parameters and pure-JAX reference
# --------------------------------------------------------------------------
def init_params(key, C, r=16):
    """Synthetic parameters: xavier-normal weights (as in the module), small biases."""
    Cmid = max(C // r, 1)
    k1, k2, k3, k4 = jax.random.split(key, 4)

    def xavier(k, shape):  # shape = (fan_out, fan_in)
        std = (2.0 / (shape[0] + shape[1])) ** 0.5
        return std * jax.random.normal(k, shape, jnp.float32)

    w1 = xavier(k1, (Cmid, C))                                 # Linear(C -> Cmid)
    w2 = xavier(k2, (C, Cmid))                                 # Linear(Cmid -> C)
    b1 = 0.1 * jax.random.normal(k3, (Cmid, 1), jnp.float32)
    b2 = 0.1 * jax.random.normal(k4, (C, 1), jnp.float32)
    return w1, b1, w2, b2


def ref_forward(x, params):
    """Pure-JAX reference mirroring the PyTorch ChannelAttention module."""
    w1, b1, w2, b2 = params
    B, C, H, W = x.shape
    xf = x.reshape(B, C, H * W)
    p_avg = xf.mean(-1)                                        # (B, C)
    p_max = xf.max(-1)                                         # (B, C)

    def mlp(p):                                                # p: (B, C)
        h = jnp.maximum(p @ w1.T + b1[:, 0], 0.0)
        return h @ w2.T + b2[:, 0]

    scale = jax.nn.sigmoid(mlp(p_avg) + mlp(p_max))            # (B, C)
    return x * scale[:, :, None, None]


if __name__ == "__main__":
    B, C, H, W = 2, 4, 16, 16
    key = jax.random.PRNGKey(0)
    kx, kp = jax.random.split(key)
    x = jax.random.normal(kx, (B, C, H, W), jnp.float32)
    params = init_params(kp, C, r=16)

    out = channel_attention(x, params)
    out = jax.block_until_ready(out)

    ref = ref_forward(x, params)
    np.testing.assert_allclose(np.asarray(out), np.asarray(ref),
                               rtol=1e-5, atol=1e-5)
    print("KERNEL_OK")
</pallas_src>

<mosaic_0001>
module attributes {stable_mosaic.version = 11 : i64} {
  func.func @_fused_kernel(%arg0: i32, %arg1: memref<1x4x256xf32, #tpu.memory_space<vmem>>, %arg2: memref<1x4xf32, #tpu.memory_space<vmem>>, %arg3: memref<1x1xf32, #tpu.memory_space<vmem>>, %arg4: memref<4x1xf32, #tpu.memory_space<vmem>>, %arg5: memref<4x1xf32, #tpu.memory_space<vmem>>, %arg6: memref<1x4x256xf32, #tpu.memory_space<vmem>>, %arg7: memref<4x128xf32, #tpu.memory_space<vmem>>, %arg8: memref<4x128xf32, #tpu.memory_space<vmem>>) attributes {dimension_semantics = [#tpu.dimension_semantics<parallel>], iteration_bounds = array<i64: 2>, scalar_prefetch = 0 : i64, scratch_operands = 2 : i64, tpu.core_type = #tpu.core_type<tc>, window_params = [{transform_indices = @transform_0, window_bounds = array<i64: 1, 4, 256>}, {pipeline_mode = #tpu.pipeline_mode<synchronous>, transform_indices = @transform_1, window_bounds = array<i64: 1, 4>}, {pipeline_mode = #tpu.pipeline_mode<synchronous>, transform_indices = @transform_2, window_bounds = array<i64: 1, 1>}, {pipeline_mode = #tpu.pipeline_mode<synchronous>, transform_indices = @transform_3, window_bounds = array<i64: 4, 1>}, {pipeline_mode = #tpu.pipeline_mode<synchronous>, transform_indices = @transform_4, window_bounds = array<i64: 4, 1>}, {transform_indices = @transform_5, window_bounds = array<i64: 1, 4, 256>}]} {
    %cst = arith.constant 0.000000e+00 : f32
    %0 = vector.broadcast %cst : f32 to vector<4x128xf32>
    %c0 = arith.constant 0 : index
    %c0_0 = arith.constant 0 : index
    %1 = vector.load %arg7[%c0, %c0_0] : memref<4x128xf32, #tpu.memory_space<vmem>>, vector<4x128xf32>
    tpu.vector_store %arg7[%c0, %c0_0], %0 {strides = array<i32>} : memref<4x128xf32, #tpu.memory_space<vmem>>, vector<4x128xf32>,
    %cst_1 = arith.constant 0xFF800000 : f32
    %2 = vector.broadcast %cst_1 : f32 to vector<4x128xf32>
    %c0_2 = arith.constant 0 : index
    %c0_3 = arith.constant 0 : index
    %3 = vector.load %arg8[%c0_2, %c0_3] : memref<4x128xf32, #tpu.memory_space<vmem>>, vector<4x128xf32>
    tpu.vector_store %arg8[%c0_2, %c0_3], %2 {strides = array<i32>} : memref<4x128xf32, #tpu.memory_space<vmem>>, vector<4x128xf32>,
    %c0_i32 = arith.constant 0 : i32
    %c128_i32 = arith.constant 128 : i32
    %4 = arith.muli %c0_i32, %c128_i32 : i32
    %5 = tpu.assume_multiple %4, 128 : i32
    %c0_4 = arith.constant 0 : index
    %c0_5 = arith.constant 0 : index
    %6 = arith.index_cast %5 : i32 to index
    %7 = vector.load %arg1[%c0_4, %c0_5, %6] : memref<1x4x256xf32, #tpu.memory_space<vmem>>, vector<1x4x128xf32>
    %8 = vector.shape_cast %7 : vector<1x4x128xf32> to vector<4x128xf32>
    %c0_6 = arith.constant 0 : index
    %c0_7 = arith.constant 0 : index
    %9 = vector.load %arg7[%c0_6, %c0_7] : memref<4x128xf32, #tpu.memory_space<vmem>>, vector<4x128xf32>
    %10 = arith.addf %9, %8 : vector<4x128xf32>
    %c0_8 = arith.constant 0 : index
    %c0_9 = arith.constant 0 : index
    %11 = vector.load %arg7[%c0_8, %c0_9] : memref<4x128xf32, #tpu.memory_space<vmem>>, vector<4x128xf32>
    tpu.vector_store %arg7[%c0_8, %c0_9], %10 {strides = array<i32>} : memref<4x128xf32, #tpu.memory_space<vmem>>, vector<4x128xf32>,
    %c0_10 = arith.constant 0 : index
    %c0_11 = arith.constant 0 : index
    %12 = vector.load %arg8[%c0_10, %c0_11] : memref<4x128xf32, #tpu.memory_space<vmem>>, vector<4x128xf32>
    %13 = arith.maximumf %12, %8 : vector<4x128xf32>
    %c0_12 = arith.constant 0 : index
    %c0_13 = arith.constant 0 : index
    %14 = vector.load %arg8[%c0_12, %c0_13] : memref<4x128xf32, #tpu.memory_space<vmem>>, vector<4x128xf32>
    tpu.vector_store %arg8[%c0_12, %c0_13], %13 {strides = array<i32>} : memref<4x128xf32, #tpu.memory_space<vmem>>, vector<4x128xf32>,
    %c1_i32 = arith.constant 1 : i32
    %c128_i32_14 = arith.constant 128 : i32
    %15 = arith.muli %c1_i32, %c128_i32_14 : i32
    %16 = tpu.assume_multiple %15, 128 : i32
    %c0_15 = arith.constant 0 : index
    %c0_16 = arith.constant 0 : index
    %17 = arith.index_cast %16 : i32 to index
    %18 = vector.load %arg1[%c0_15, %c0_16, %17] : memref<1x4x256xf32, #tpu.memory_space<vmem>>, vector<1x4x128xf32>
    %19 = vector.shape_cast %18 : vector<1x4x128xf32> to vector<4x128xf32>
    %c0_17 = arith.constant 0 : index
    %c0_18 = arith.constant 0 : index
    %20 = vector.load %arg7[%c0_17, %c0_18] : memref<4x128xf32, #tpu.memory_space<vmem>>, vector<4x128xf32>
    %21 = arith.addf %20, %19 : vector<4x128xf32>
    %c0_19 = arith.constant 0 : index
    %c0_20 = arith.constant 0 : index
    %22 = vector.load %arg7[%c0_19, %c0_20] : memref<4x128xf32, #tpu.memory_space<vmem>>, vector<4x128xf32>
    tpu.vector_store %arg7[%c0_19, %c0_20], %21 {strides = array<i32>} : memref<4x128xf32, #tpu.memory_space<vmem>>, vector<4x128xf32>,
    %c0_21 = arith.constant 0 : index
    %c0_22 = arith.constant 0 : index
    %23 = vector.load %arg8[%c0_21, %c0_22] : memref<4x128xf32, #tpu.memory_space<vmem>>, vector<4x128xf32>
    %24 = arith.maximumf %23, %19 : vector<4x128xf32>
    %c0_23 = arith.constant 0 : index
    %c0_24 = arith.constant 0 : index
    %25 = vector.load %arg8[%c0_23, %c0_24] : memref<4x128xf32, #tpu.memory_space<vmem>>, vector<4x128xf32>
    tpu.vector_store %arg8[%c0_23, %c0_24], %24 {strides = array<i32>} : memref<4x128xf32, #tpu.memory_space<vmem>>, vector<4x128xf32>,
    %c2_i32 = arith.constant 2 : i32
    %c0_25 = arith.constant 0 : index
    %c0_26 = arith.constant 0 : index
    %26 = vector.load %arg7[%c0_25, %c0_26] : memref<4x128xf32, #tpu.memory_space<vmem>>, vector<4x128xf32>
    %cst_27 = arith.constant dense<0.000000e+00> : vector<4xf32>
    %27 = vector.multi_reduction <add>, %26, %cst_27 [1] : vector<4x128xf32> to vector<4xf32>
    %28 = vector.shape_cast %27 : vector<4xf32> to vector<4x1xf32>
    %c0_28 = arith.constant 0 : index
    %c0_29 = arith.constant 0 : index
    %29 = vector.load %arg8[%c0_28, %c0_29] : memref<4x128xf32, #tpu.memory_space<vmem>>, vector<4x128xf32>
    %cst_30 = arith.constant dense<0xFF800000> : vector<4xf32>
    %30 = vector.multi_reduction <maximumf>, %29, %cst_30 [1] : vector<4x128xf32> to vector<4xf32>
    %31 = vector.shape_cast %30 : vector<4xf32> to vector<4x1xf32>
    %cst_31 = arith.constant 3.906250e-03 : f32
    %32 = vector.broadcast %cst_31 : f32 to vector<4x1xf32>
    %33 = arith.mulf %28, %32 : vector<4x1xf32>
    %34 = tpu.concatenate %33, %31 in 1 : vector<4x1xf32>, vector<4x1xf32> -> vector<4x2xf32>
    %c0_32 = arith.constant 0 : index
    %c0_33 = arith.constant 0 : index
    %35 = vector.load %arg2[%c0_32, %c0_33] : memref<1x4xf32, #tpu.memory_space<vmem>>, vector<1x4xf32>
    %cst_34 = arith.constant dense<0.000000e+00> : vector<1x2xf32>
    %36 = tpu.matmul %35, %34, %cst_34 {dimension_numbers = #tpu.dot_dimension_numbers<[1], [0], [0], [1], [0, 0, 1, 1], [], []>} : vector<1x4xf32>, vector<4x2xf32>, vector<1x2xf32> -> vector<1x2xf32>
    %c0_35 = arith.constant 0 : index
    %c0_36 = arith.constant 0 : index
    %37 = vector.load %arg3[%c0_35, %c0_36] : memref<1x1xf32, #tpu.memory_space<vmem>>, vector<1x1xf32>
    %38 = vector.broadcast %37 : vector<1x1xf32> to vector<1x2xf32>
    %39 = arith.addf %36, %38 : vector<1x2xf32>
    %cst_37 = arith.constant 0.000000e+00 : f32
    %40 = vector.broadcast %cst_37 : f32 to vector<1x2xf32>
    %41 = arith.maximumf %39, %40 : vector<1x2xf32>
    %c0_38 = arith.constant 0 : index
    %c0_39 = arith.constant 0 : index
    %42 = vector.load %arg4[%c0_38, %c0_39] : memref<4x1xf32, #tpu.memory_space<vmem>>, vector<4x1xf32>
    %cst_40 = arith.constant dense<0.000000e+00> : vector<4x2xf32>
    %43 = tpu.matmul %42, %41, %cst_40 {dimension_numbers = #tpu.dot_dimension_numbers<[1], [0], [0], [1], [0, 0, 1, 1], [], []>} : vector<4x1xf32>, vector<1x2xf32>, vector<4x2xf32> -> vector<4x2xf32>
    %c0_41 = arith.constant 0 : index
    %c0_42 = arith.constant 0 : index
    %44 = vector.load %arg5[%c0_41, %c0_42] : memref<4x1xf32, #tpu.memory_space<vmem>>, vector<4x1xf32>
    %45 = vector.broadcast %44 : vector<4x1xf32> to vector<4x2xf32>
    %46 = arith.addf %43, %45 : vector<4x2xf32>
    %47 = vector.extract_strided_slice %46 {offsets = [0, 0], sizes = [4, 1], strides = [1, 1]} : vector<4x2xf32> to vector<4x1xf32>
    %48 = vector.extract_strided_slice %46 {offsets = [0, 1], sizes = [4, 1], strides = [1, 1]} : vector<4x2xf32> to vector<4x1xf32>
    %49 = arith.addf %47, %48 : vector<4x1xf32>
    %50 = arith.negf %49 : vector<4x1xf32>
    %51 = math.exp %50 : vector<4x1xf32>
    %cst_43 = arith.constant 1.000000e+00 : f32
    %52 = vector.broadcast %cst_43 : f32 to vector<4x1xf32>
    %53 = arith.addf %52, %51 : vector<4x1xf32>
    %54 = arith.divf %52, %53 : vector<4x1xf32>
    %c0_i32_44 = arith.constant 0 : i32
    %c256_i32 = arith.constant 256 : i32
    %55 = arith.muli %c0_i32_44, %c256_i32 : i32
    %56 = tpu.assume_multiple %55, 256 : i32
    %c0_45 = arith.constant 0 : index
    %c0_46 = arith.constant 0 : index
    %57 = arith.index_cast %56 : i32 to index
    %58 = vector.load %arg1[%c0_45, %c0_46, %57] : memref<1x4x256xf32, #tpu.memory_space<vmem>>, vector<1x4x256xf32>
    %59 = vector.shape_cast %58 : vector<1x4x256xf32> to vector<4x256xf32>
    %60 = vector.broadcast %54 : vector<4x1xf32> to vector<4x256xf32>
    %61 = arith.mulf %59, %60 : vector<4x256xf32>
    %c0_47 = arith.constant 0 : index
    %c0_48 = arith.constant 0 : index
    %62 = arith.index_cast %56 : i32 to index
    %63 = vector.load %arg6[%c0_47, %c0_48, %62] : memref<1x4x256xf32, #tpu.memory_space<vmem>>, vector<1x4x256xf32>
    %64 = vector.shape_cast %63 : vector<1x4x256xf32> to vector<4x256xf32>
    %65 = vector.shape_cast %61 : vector<4x256xf32> to vector<1x4x256xf32>
    tpu.vector_store %arg6[%c0_47, %c0_48, %62], %65 {strides = array<i32>} : memref<1x4x256xf32, #tpu.memory_space<vmem>>, vector<1x4x256xf32>,
    %c1_i32_49 = arith.constant 1 : i32
    return
  }
  func.func @transform_0(%arg0: i32) -> (i32, i32, i32) {
    %c0_i32 = arith.constant 0 : i32
    %c0_i32_0 = arith.constant 0 : i32
    %c0_i32_1 = arith.constant 0 : i32
    return %arg0, %c0_i32, %c0_i32_0 : i32, i32, i32
  }
  func.func @transform_1(%arg0: i32) -> (i32, i32) {
    %c0_i32 = arith.constant 0 : i32
    %c0_i32_0 = arith.constant 0 : i32
    %c0_i32_1 = arith.constant 0 : i32
    return %c0_i32, %c0_i32_0 : i32, i32
  }
  func.func @transform_2(%arg0: i32) -> (i32, i32) {
    %c0_i32 = arith.constant 0 : i32
    %c0_i32_0 = arith.constant 0 : i32
    %c0_i32_1 = arith.constant 0 : i32
    return %c0_i32, %c0_i32_0 : i32, i32
  }
  func.func @transform_3(%arg0: i32) -> (i32, i32) {
    %c0_i32 = arith.constant 0 : i32
    %c0_i32_0 = arith.constant 0 : i32
    %c0_i32_1 = arith.constant 0 : i32
    return %c0_i32, %c0_i32_0 : i32, i32
  }
  func.func @transform_4(%arg0: i32) -> (i32, i32) {
    %c0_i32 = arith.constant 0 : i32
    %c0_i32_0 = arith.constant 0 : i32
    %c0_i32_1 = arith.constant 0 : i32
    return %c0_i32, %c0_i32_0 : i32, i32
  }
  func.func @transform_5(%arg0: i32) -> (i32, i32, i32) {
    %c0_i32 = arith.constant 0 : i32
    %c0_i32_0 = arith.constant 0 : i32
    %c0_i32_1 = arith.constant 0 : i32
    return %arg0, %c0_i32, %c0_i32_0 : i32, i32, i32
  }
}

</mosaic_0001>

<bundles_post_ra>
// kernel: tpu_custom_call.1
= control target key start
LH: loop header
LB: loop body
LE: loop exit
PB: predicated region body
PF: predicated region fallthrough
CT: control target
= control target key end

     0   :  { %s833_s0 = inlined_call_operand.hbm [shape: f32[2,4,256], index: 0, kind: input, shape index: {}]   ;;  %s834_s1 = inlined_call_operand.vmem [shape: f32[1,4], index: 1, kind: input, shape index: {}]   ;;  %s835_s2 = inlined_call_operand.<no memory space> [shape: f32[1,1], index: 2, kind: input, shape index: {}]   ;;  %s836_s3 = inlined_call_operand.vmem [shape: f32[4,1], index: 3, kind: input, shape index: {}]   ;;  %s837_s4 = inlined_call_operand.vmem [shape: f32[4,1], index: 4, kind: input, shape index: {}]   ;;  %s838_s5 = inlined_call_operand.hbm [shape: f32[2,4,256], index: 5, kind: output, shape index: {}]  }
   0x1   :  { %v10_v0 = vstv %s835_s2 }
   0x2   :  { %11 = vst [vmem:[#allocation4] sm:$0x1] %v10_v0 }
   0x3   :  { %12 = vsyncpa [#allocation6], 0 }
   0x4   :  { %14 = vsyncpa [#allocation6 + $0x1], 0 }
   0x5   :  { %15 = vsyncpa [#allocation7], 0 }
   0x6   :  { %17 = vsyncpa [#allocation7 + $0x1], 0  ;;  %s683_s20 = smov 0   ;;  %s685_s21 = smov 0  }
   0x7   :  { %s687_s22 = smov 0   ;;  %s689_s23 = smov 0  }
   0x8 LB: > { %s704_s2 = sadd.s32 4294967295, %s643_s23   ;;  %s467_s24 = sadd.s32 4294967294, %s643_s23   ;;  %s643_s23 = sphi %s689_s23, %s848_s23   ;;  %s639_s22 = sphi %s687_s22, %s847_s22   ;;  %s635_s21 = sphi %s685_s21, %s846_s21   ;;  %s631_s20 = sphi %s683_s20, %s845_s20  }
   0x9   : > { %s708_s25 = sadd.s32 1, %s643_s23   ;;  %s30_s26 = sadd.s32 1, %s639_s22 }
   0xa   : > { %s27_s27 = ssub.s32 %s643_s23, %s708_s25  ;;  %p37_p0 = scmp.ne.s32.totalorder %s639_s22, %s635_s21 }
   0xb   : > { %p28_p1 = scmp.eq.s32.totalorder %s27_s27, 0  ;;  %p38_p2 = scmp.eq.s32.totalorder %s643_s23, 0 }
   0xc   : > { %p43_p3 = scmp.ne.s32.totalorder %s635_s21, %s631_s20  ;;  %p44_p4 = scmp.eq.s32.totalorder %s704_s2, 0 }
   0xd   : > { %s720_s28 = scalar_select %p28_p1, %s639_s22, %s30_s26  }
   0xe   : > { %p722_p5 = por %p38_p2, %p37_p0  ;;  %p726_p6 = por %p44_p4, %p43_p3 }
   0xf   : > { %p151_p7 = scmp.eq.s32.totalorder %s704_s2, 1  ;;  %p157_p8 = scmp.eq.s32.totalorder %s467_s24, 1 }
  0x10   : > { %p501_p10 = scmp.lt.s32.totalorder %s643_s23, 2  ;;  %s189_s8 = sand.u32 1, %s639_s22  }
  0x11   : > { %p733_p11 = por %p151_p7, %p37_p0  ;;  %p737_p12 = por %p157_p8, %p43_p3 }
  0x12   : > { %s487_s9 = sshll.u32 %s643_s23, 3  ;;  %s470_s10 = sshll.u32 %s189_s8, 3 }
  0x13   : > { %s198_s13 = scalar_lea.hbm %s833_s0, %s487_s9  ;;  %s193_s15 = scalar_lea.vmem [#allocation5], %s470_s10 }
  0x14   : > { %s200_s14 = sshll.u32 %s198_s13, 4  ;;  %s202_s16 = sshll.u32 %s193_s15, 4  ;;  %s201_s14 = int_to_ptr.hbm [resolvable:$true] %s200_s14  ;;  %s203_s16 = int_to_ptr.vmem [resolvable:$true] %s202_s16 }
  0x15   : > { %p748_p13 = pnand %p501_p10, %p722_p5  ;;  %p473_p0 = scmp.ge.s32.totalorder %s643_s23, 1 }
  0x16   : > { %p207_p1 = scmp.lt.s32.totalorder %s643_s23, 3  ;;  %s190_s18 = scalar_lea.sflag [#allocation6], %s189_s8 }
  0x17   : > { %s547_s19 = sshra.s32 %s201_s14, 4  ;;  %p551_p3 = pneg %p748_p13  ;;  %s548_s19 = int_to_ptr.hbm [resolvable:$true] %s547_s19 }
  0x18   : > { %s549_s24 = scalar_lea.hbm %s548_s19, 8  ;;  %s554_s29 = scalar_lea.hbm %s833_s0, 16 }
  0x19   : > { %p550_p2 = scmp.ne.s32.totalorder %s548_s19, %s549_s24  ;;  %p555_p5 = scmp.lt.s32.totalorder %s548_s19, %s833_s0 }
  0x1a   : > { %p556_p8 = scmp.lt.s32.totalorder %s554_s29, %s549_s24 }
  0x1b   : > { %p552_p4 = pnand %p551_p3, %p550_p2 }
  0x1c   : > { %p557_p10 = por %p556_p8, %p555_p5 }
  0x1d   : > { %p553_p7 = pneg %p552_p4 }
  0x1f   : > { %p558_p9 = pnand %p557_p10, %p553_p7 }
  0x21   : > { %561 = shalt.err (!%p558_p9)
}
  0x22   : > { %496 = dma.hbm_to_vmem [thread:$0]  (!%p748_p13), %s201_s14, 128, %s203_s16, %s190_s18  }
  0x23   : > { %p208_p2 = pnand %p473_p0, %p207_p1 }
  0x24   : > { %s769_s8 = sand.u32 (!%p208_p2), 1, %s635_s21  }
  0x25   : > { %211 = sbr.rel (%p208_p2) target bundleno = 677 (0x2a5), region = 40  ;;  %s474_s11 = sshll.u32 (!%p208_p2), %s769_s8, 3 }
  0x26   : > { %s214_s12 = scalar_lea.sflag (!%p208_p2), [#allocation6], %s769_s8  ;;  %s775_s13 = scalar_lea.vmem (!%p208_p2), [#allocation5], %s474_s11 }
  0x2a   : > { %622 = dma.done.wait (%p726_p6), %s214_s12, 128  }
  0x2b   : > { %624 = vsyncadd (%p726_p6), %s214_s12, 4294967168  ;;  %v645_v1 = vmov 0.0   ;;  %v646_v2 = vmov -inf   ;;  %v247_v3 = vld [vmem:[%s775_s13] sm:$0xf]  ;;  %vm263_vm0 = vcmask 1043456  }
  0x2c   : > { %245 = vst [vmem:[#allocation2] sm:$0xf] %v645_v1  ;;  %v476_v8 = vld [vmem:[%s775_s13 + $0x4] sm:$0xf]  ;;  %v647_v17 = vmov 0   ;;  %vm272_vm1 = vcmask 7168  }
  0x2d   : > { %246 = vst [vmem:[#allocation3] sm:$0xf] %v646_v2  ;;  %540 = vset.pattern.permute.xlu1 %v647_v17  ;;  %v275_v18 = vld [vmem:[#allocation4] sm:$0x1]  ;;  %541 = vset.pattern.permute.xlu2 %v647_v17  ;;  %v311_v19 = vld [vmem:[%s837_s4] sm:$0xf] }
  0x2e   : > { %278 = vperm.xlu1 %540, %v275_v18   ;;  %542 = vset.pattern.permute.xlu0 %v647_v17  ;;  %v274_v23 = vld [vmem:[%s834_s1] sm:$0x1]  ;;  %vm282_vm2 = vcmask 31744   ;;  %vm320_vm3 = vcmask 1040384   ;;  %s648_s19 = smov 127   ;;  %s488_s24 = sshll.u32 %s704_s2, 3 }
  0x2f   : > { %v310_v30 = vld [vmem:[%s836_s3] sm:$0xf]  ;;  %v649_v49 = vmov 839922192   ;;  %s392_s29 = scalar_lea.hbm %s838_s5, %s488_s24  ;;  %v368_v52 = vld [vmem:[%s775_s13] sm:$0xff]  ;;  %s244_s9 = scalar_lea.vmem [#allocation8], %s474_s11 }
  0x30   : > { %v374_v50 = vunpack.c.l.s4 %v649_v49  ;;  %s394_s10 = sshll.u32 %s244_s9, 4  ;;  %s396_s12 = sshll.u32 %s392_s29, 4  ;;  %s395_s10 = int_to_ptr.vmem [resolvable:$true] %s394_s10  ;;  %s397_s12 = int_to_ptr.hbm [resolvable:$true] %s396_s12 }
  0x31   : > { %s381_s30 = scalar_lea.sflag [#allocation7], %s769_s8  ;;  %s591_s14 = sshra.s32 %s397_s12, 4  ;;  %s592_s14 = int_to_ptr.hbm [resolvable:$true] %s591_s14 }
  0x32   : > { %v375_v51 = vunpack.c.0.s8 %v374_v50  ;;  %s593_s2 = scalar_lea.hbm %s592_s14, 8  ;;  %s597_s16 = scalar_lea.hbm %s838_s5, 16 }
  0x33   : > { %v248_v4 = vld [vmem:[#allocation2] sm:$0xf]  ;;  %p594_p6 = scmp.ne.s32.totalorder %s592_s14, %s593_s2  ;;  %p598_p0 = scmp.lt.s32.totalorder %s592_s14, %s838_s5 }
  0x34   : > { %v249_v5 = vadd.f32 %v248_v4, %v247_v3  ;;  %v251_v6 = vld [vmem:[#allocation3] sm:$0xf]  ;;  %p599_p1 = scmp.lt.s32.totalorder %s597_s16, %s593_s2 }
  0x35   : > { %v252_v7 = vmax.f32 %v251_v6, %v247_v3  ;;  %p595_p9 = pnand %p594_p6, %p733_p11 }
  0x36   : > { %250 = vst [vmem:[#allocation2] sm:$0xf] %v249_v5  ;;  %314 = vperm.xlu1 %540, %v311_v19   ;;  %p600_p3 = por %p599_p1, %p598_p0 }
  0x37   : > { %253 = vst [vmem:[#allocation3] sm:$0xf] %v252_v7  ;;  %p596_p13 = pneg %p595_p9 }
  0x39   : > { %p601_p4 = pnand %p600_p3, %p596_p13 }
  0x3d   : > { %v256_v9 = vld [vmem:[#allocation2] sm:$0xf] }
  0x3e   : > { %v257_v10 = vadd.f32 %v476_v8, %v256_v9  ;;  %v259_v11 = vld [vmem:[#allocation3] sm:$0xf] }
  0x3f   : > { %v260_v12 = vmax.f32 %v259_v11, %v476_v8 }
  0x40   : > { %258 = vst [vmem:[#allocation2] sm:$0xf] %v257_v10 }
  0x41   : > { %261 = vst [vmem:[#allocation3] sm:$0xf] %v260_v12 }
  0x47   : > { %v262_v13 = vld [vmem:[#allocation2] sm:$0xf] }
  0x48   : > { %v264_v14 = vsel %vm263_vm0, %v262_v13, 0.0  ;;  %v267_v15 = vld [vmem:[#allocation3] sm:$0xf] }
  0x49   : > { %265 = vadd.xlane.f32.xlu0 %v264_v14  ;;  %v268_v16 = vsel %vm263_vm0, %v267_v15, -inf }
  0x51   : > { %269 = vmax.xlane.f32.xlu0 %v268_v16 }
  0xa0   : > { %v279_v25 = vpop.permute.xlu1 %278 }
  0xa1   : > { %v281_v26 = vperm.slane %v279_v25, 0 }
  0xa8   : > { %v315_v31 = vpop.permute.xlu1 %314 }
  0xbc   : > { %v266_v20 = vpop.xlane.xlu0 %265 }
  0xbd   : > { %v271_v21 = vmul.f32 0.00390625, %v266_v20 }
  0xc4   : > { %v270_v22 = vpop.xlane.xlu0 %269 }
  0xc5   : > { %v273_v24 = vsel %vm272_vm1, %v271_v21, %v270_v22 }
  0xc6   : > { %477 = vmatpush.msk.msra.mxu0 %vm263_vm0, %v273_v24 }
  0xc7   : > { %478 = vmatmul.msk.f32.vlgmr.msra.gmra.mxu0 %vm282_vm2, %v274_v23 }
 0x144   : > { %v306_v27 = vpop.f32.mrf.mxu0 }
 0x145   : > { %v307_v28 = vadd.f32 %v306_v27, %v281_v26 }
 0x147   : > { %v309_v29 = vmax.f32 %v307_v28, 0.0 }
 0x149   : > { %479 = vmatpush.msk.msra.mxu1 %vm320_vm3, %v309_v29 }
 0x14a   : > { %480 = vmatmul.msk.f32.vlgmr.msra.gmra.mxu1 %vm272_vm1, %v310_v30 }
 0x1c7   : > { %v341_v32 = vpop.f32.mrf.mxu1 }
 0x1c8   : > { %v342_v33 = vadd.f32 %v341_v32, %v315_v31 }
 0x1ca   : > { %345 = vrot.lane.b32.xlu2 %v342_v33, %s648_s19 }
 0x224   : > { %v346_v34 = vpop.permute.xlu2 %345 }
 0x225   : > { %v348_v35 = vadd.f32 %v346_v34, %v342_v33 }
 0x227   : > { %v481_v36 = vmul.f32 -1.442695, %v348_v35 }
 0x229   : > { %543 = vpow2.f32 %v481_v36 }
 0x22f   : > { %v544_v37 = vpop.eup %543 }
 0x230   : > { %v352_v38 = vadd.f32 1.0, %v544_v37 }
 0x232   : > { %545 = vrcp.f32 %v352_v38  ;;  %v364_v42 = vand.u32 2147483648, %v352_v38  ;;  %v362_v44 = vand.u32 2147483647, %v352_v38  ;;  %vm358_vm5 = vweird.f32 %v352_v38 }
 0x234   : > { %v365_v46 = vor.u32 1.1754944e-38, %v364_v42  ;;  %vm363_vm7 = vcmp.eq.f32.partialorder %v362_v44, 8.507059e+37 }
 0x238   : > { %v546_v39 = vpop.eup %545 }
 0x239   : > { %v354_v40 = vmul.f32 %v546_v39, %v352_v38  ;;  %vm359_vm4 = vweird.f32 %v546_v39 }
 0x23a   : > { %vm360_vm6 = vmor %vm358_vm5, %vm359_vm4 }
 0x23b   : > { %v355_v41 = vsub.f32 1.0, %v354_v40 }
 0x23d   : > { %v356_v43 = vmul.f32 %v546_v39, %v355_v41 }
 0x23f   : > { %v357_v45 = vadd.f32 %v546_v39, %v356_v43 }
 0x241   : > { %v361_v47 = vsel %vm360_vm6, %v546_v39, %v357_v45 }
 0x242   : > { %v366_v48 = vsel %vm363_vm7, %v365_v46, %v361_v47 }
 0x243   : > { %371 = vperm.xlu2 %541, %v366_v48  }
 0x29d   : > { %v372_v53 = vpop.permute.xlu2 %371 }
 0x29e   : > { %v376_v54 = vperm.slane %v372_v53, %v375_v51 }
 0x2a0   : > { %v378_v55 = vmul.f32 %v376_v54, %v368_v52 }
 0x2a2   : > { %379 = vst [vmem:[%s244_s9] sm:$0xff] %v378_v55 }
 0x2a3   : > { %604 = shalt.err (!%p601_p4)
}
 0x2a4   : > { %491 = dma.vmem_to_hbm [thread:$0]  (%p733_p11), %s395_s10, 128, %s397_s12, %s381_s30  }
 0x2a5 PF: > { %s408_s8 = sand.u32 1, %s631_s20   ;;  %p844_p7 = scmp.ge.s32.totalorder %s643_s23, 2 }
 0x2a6   : > { %s409_s18 = scalar_lea.sflag [#allocation7], %s408_s8 }
 0x2a7   : > { %p498_p5 = pnand %p844_p7, %p737_p12 }
 0x2a9   : > { %p499_p8 = pneg %p498_p5 }
 0x2ab   : > { %626 = dma.done.wait (%p499_p8), %s409_s18, 128  }
 0x2ac   : > { %628 = vsyncadd (%p499_p8), %s409_s18, 4294967168  ;;  %p20_p10 = scmp.ge.s32.totalorder %s708_s25, 4   ;;  %s845_s20 = smov %s635_s21 }
 0x2ad   : > { %s846_s21 = smov %s639_s22  ;;  %s847_s22 = smov %s720_s28 }
 0x2ae   : > { %s848_s23 = smov %s708_s25  ;;  %22 = sbr.rel (!%p20_p10) target bundleno = 8 (0x8), region = 86 }
 0x2b3   :  { %415 = vsyncpa [#allocation6], 1 }
 0x2b4   :  { %417 = vsyncpa [#allocation6 + $0x1], 1 }
 0x2b5   :  { %418 = vsyncpa [#allocation7], 1 }
 0x2b6   :  { %420 = vsyncpa [#allocation7 + $0x1], 1 }

</bundles_post_ra>
